<compile_context>
chip_gen: v7x
topology: tpu7x:2x2x1
jax: 0.10.0
libtpu: 0.0.40
codegen_flags: <defaults>
</compile_context>

<pallas_src>
import functools

import jax
import jax.numpy as jnp
from jax import lax
from jax.experimental import pallas as pl
from jax.experimental.pallas import tpu as pltpu

EPS = 1e-15


def _sigmoid(x):
    return 1.0 / (1.0 + jnp.exp(-x))


def _round_up(x, m):
    return ((x + m - 1) // m) * m


def _ml_kernel(scale_ref, pos_ref, prop_ref, neg_ref, *rest,
               n_rows, tile_n, tiles_per_core, bilinear):
    if bilinear:
        w_ref, out_ref, acc_ref = rest
    else:
        w_ref = None
        out_ref, acc_ref = rest

    c = pl.program_id(0)                       # core / partial-loss index
    j = pl.program_id(1)                       # N-tile index within this core
    n_j = pl.num_programs(1)

    @pl.when(j == 0)
    def _():
        acc_ref[...] = jnp.zeros_like(acc_ref)

    inv_mu = scale_ref[0]                      # f32 scalar from SMEM

    prop = prop_ref[...]                       # [tile_n, D], native dtype
    if bilinear:
        # W was pre-transposed in the wrapper: prop @ W^T == (W @ prop_row) per row.
        # Native-dtype operands go straight to the MXU; accumulation is f32.
        prop_eff = jnp.dot(prop, w_ref[...], preferred_element_type=jnp.float32)
    else:
        prop_eff = prop.astype(jnp.float32)

    # Elementwise products promote to f32 via prop_eff; scale AFTER the reduction.
    pos_dot = jnp.sum(pos_ref[...] * prop_eff, axis=-1, keepdims=True) * inv_mu
    neg_dot = jnp.sum(neg_ref[...] * prop_eff, axis=-1, keepdims=True) * inv_mu

    # Mask padded rows (partial last tile and fully-OOB clamped tiles).
    base = (c * tiles_per_core + j) * tile_n
    row_ids = base + lax.broadcasted_iota(jnp.int32, (tile_n, 1), 0)
    valid = row_ids < n_rows
    pos_dot = jnp.where(valid, pos_dot, 0.0)
    neg_dot = jnp.where(valid, neg_dot, 0.0)

    terms = (-jnp.log(_sigmoid(pos_dot) + EPS)
             - jnp.log(1.0 - _sigmoid(neg_dot) + EPS))            # [tile_n, 1]
    terms = jnp.where(valid, terms, 0.0)

    # Per-row accumulation: plain VPU add each step; XLU reduce only at the end.
    acc_ref[...] += terms

    @pl.when(j == n_j - 1)
    def _():
        out_ref[...] = jnp.sum(acc_ref[...], axis=0,
                               keepdims=True).reshape(1, 1, 1)


@functools.partial(jax.jit, static_argnames=("bilinear", "tile_n"))
def ml_forward(pos_z, prop_z, perm, mu=1.0, contrast_weight=None,
               bilinear=False, tile_n=None):
    n, d = pos_z.shape
    itemsize = jnp.dtype(pos_z.dtype).itemsize

    if tile_n is None:
        # Memory-bound streaming: biggest row tile whose block is ~2 MiB
        # (3 streamed inputs x 2 pipeline buffers ~ 12 MiB VMEM total).
        budget_rows = (2 * 1024 * 1024) // max(1, d * itemsize)
        tile_n = max(8, min(2048, budget_rows))
    tile_n = _round_up(min(int(tile_n), max(n, 1)), 8)
    num_tiles = -(-n // tile_n)

    # Negative sampling: one XLA gather in the wrapper, streamed like pos/prop.
    neg_z = jnp.take(pos_z, jnp.asarray(perm, dtype=jnp.int32), axis=0)

    inv_mu = (1.0 / jnp.asarray(mu, dtype=jnp.float32)).reshape((1,))

    # Split the N-tile loop across 2 TensorCores on v7x (sequential elsewhere).
    num_cores = 2 if num_tiles >= 2 else 1
    tiles_per_core = -(-num_tiles // num_cores)

    def row_map(c, j):
        # Clamp fully-out-of-range tiles to the last valid block; the kernel masks
        # their rows, so they contribute nothing.
        return (jnp.minimum(c * tiles_per_core + j, num_tiles - 1), 0)

    args = [inv_mu, pos_z, prop_z, neg_z]
    in_specs = [
        pl.BlockSpec(memory_space=pltpu.MemorySpace.SMEM),   # 1/mu scalar
        pl.BlockSpec((tile_n, d), row_map),                  # pos tile  (VMEM)
        pl.BlockSpec((tile_n, d), row_map),                  # prop tile (VMEM)
        pl.BlockSpec((tile_n, d), row_map),                  # neg tile  (VMEM)
    ]
    if bilinear:
        if contrast_weight is None:
            raise ValueError("bilinear=True requires contrast_weight")
        args.append(contrast_weight.T)                       # pre-transposed W
        in_specs.append(pl.BlockSpec((d, d), lambda c, j: (0, 0)))  # resident

    kernel = functools.partial(_ml_kernel, n_rows=n, tile_n=tile_n,
                               tiles_per_core=tiles_per_core, bilinear=bilinear)

    flops = 6 * n * d + (2 * n * d * d if bilinear else 0)
    bytes_accessed = 4 * n * d * itemsize + (d * d * itemsize if bilinear else 0)
    cost = pl.CostEstimate(flops=flops, transcendentals=4 * n,
                           bytes_accessed=bytes_accessed)

    partials = pl.pallas_call(
        kernel,
        out_shape=jax.ShapeDtypeStruct((num_cores, 1, 1), jnp.float32),
        grid=(num_cores, tiles_per_core),
        in_specs=in_specs,
        out_specs=pl.BlockSpec((1, 1, 1), lambda c, j: (c, 0, 0)),
        scratch_shapes=[pltpu.VMEM((tile_n, 1), jnp.float32)],   # per-row loss acc
        compiler_params=pltpu.CompilerParams(
            dimension_semantics=("parallel", "arbitrary")),
        cost_estimate=cost,
    )(*args)

    return jnp.sum(partials) / n


class ML:
    """Multi Level representation alignment (Pallas TPU version)."""

    def __init__(self, bilinear: bool):
        self.bilinear = bilinear

    def __call__(self, z_tuple, perm, mu=1.0, contrast_weight=None, tile_n=None):
        pos_z, prop_z = z_tuple
        return ml_forward(pos_z, prop_z, perm, mu=mu,
                          contrast_weight=contrast_weight,
                          bilinear=self.bilinear, tile_n=tile_n)


def ml_reference(pos_z, prop_z, perm, mu=1.0, contrast_weight=None, bilinear=False):
    """Pure-JAX reference mirroring the PyTorch forward."""
    neg_z = pos_z[perm]
    prop = prop_z / mu
    if bilinear:
        prop = prop @ contrast_weight.T
    pos_dot = jnp.sum(pos_z * prop, axis=-1)
    neg_dot = jnp.sum(neg_z * prop, axis=-1)
    pos_loss = jnp.mean(-jnp.log(_sigmoid(pos_dot) + EPS))
    neg_loss = jnp.mean(-jnp.log(1.0 - _sigmoid(neg_dot) + EPS))
    return pos_loss + neg_loss


if __name__ == "__main__":
    key = jax.random.PRNGKey(0)

    # ---- Test 1/2: small shapes matching the module (N=8, D=32), both paths.
    N, D = 8, 32
    k_pos, k_prop, k_perm, k_w, k2 = jax.random.split(key, 5)
    pos_z = jax.random.normal(k_pos, (N, D), dtype=jnp.float32)
    prop_z = jax.random.normal(k_prop, (N, D), dtype=jnp.float32)
    perm = jax.random.permutation(k_perm, N)          # deterministic "randperm"
    contrast_weight = 0.1 * jax.random.normal(k_w, (D, D), dtype=jnp.float32)
    mu = 1.5

    model_plain = ML(bilinear=False)
    out_plain = jax.block_until_ready(model_plain((pos_z, prop_z), perm, mu=mu))
    ref_plain = ml_reference(pos_z, prop_z, perm, mu=mu, bilinear=False)
    assert jnp.allclose(out_plain, ref_plain, rtol=1e-4, atol=1e-4), (out_plain, ref_plain)

    model_bi = ML(bilinear=True)
    out_bi = jax.block_until_ready(
        model_bi((pos_z, prop_z), perm, mu=mu, contrast_weight=contrast_weight))
    ref_bi = ml_reference(pos_z, prop_z, perm, mu=mu,
                          contrast_weight=contrast_weight, bilinear=True)
    assert jnp.allclose(out_bi, ref_bi, rtol=1e-4, atol=1e-4), (out_bi, ref_bi)

    # ---- Test 3: multi-tile grid with a partial last tile and the 2-way "core"
    # split (N=20, tile_n=8 -> grid (2,2) with one clamped/fully-masked tile).
    N2 = 20
    k_pos2, k_prop2, k_perm2 = jax.random.split(k2, 3)
    pos_z2 = jax.random.normal(k_pos2, (N2, D), dtype=jnp.float32)
    prop_z2 = jax.random.normal(k_prop2, (N2, D), dtype=jnp.float32)
    perm2 = jax.random.permutation(k_perm2, N2)
    out_tiled = jax.block_until_ready(
        model_bi((pos_z2, prop_z2), perm2, mu=mu,
                 contrast_weight=contrast_weight, tile_n=8))
    ref_tiled = ml_reference(pos_z2, prop_z2, perm2, mu=mu,
                             contrast_weight=contrast_weight, bilinear=True)
    assert jnp.allclose(out_tiled, ref_tiled, rtol=1e-4, atol=1e-4), (out_tiled, ref_tiled)

    # ---- Test 4: non-bilinear multi-tile path with default tile selection.
    out_plain2 = jax.block_until_ready(model_plain((pos_z2, prop_z2), perm2, mu=mu))
    ref_plain2 = ml_reference(pos_z2, prop_z2, perm2, mu=mu, bilinear=False)
    assert jnp.allclose(out_plain2, ref_plain2, rtol=1e-4, atol=1e-4), (out_plain2, ref_plain2)

    print("KERNEL_OK")
</pallas_src>

<mosaic_0001>
module attributes {stable_mosaic.version = 11 : i64} {
  func.func @_ml_kernel(%arg0: i32, %arg1: i32, %arg2: memref<1xf32, #tpu.memory_space<smem>>, %arg3: memref<8x32xf32, #tpu.memory_space<vmem>>, %arg4: memref<8x32xf32, #tpu.memory_space<vmem>>, %arg5: memref<8x32xf32, #tpu.memory_space<vmem>>, %arg6: memref<1x1x1xf32, #tpu.memory_space<vmem>>, %arg7: memref<8x1xf32, #tpu.memory_space<vmem>>) attributes {dimension_semantics = [#tpu.dimension_semantics<parallel>, #tpu.dimension_semantics<arbitrary>], iteration_bounds = array<i64: 1, 1>, scalar_prefetch = 0 : i64, scratch_operands = 1 : i64, tpu.core_type = #tpu.core_type<tc>, window_params = [{transform_indices = @transform_0, window_bounds = array<i64: 1>}, {transform_indices = @transform_1, window_bounds = array<i64: 8, 32>}, {transform_indices = @transform_2, window_bounds = array<i64: 8, 32>}, {transform_indices = @transform_3, window_bounds = array<i64: 8, 32>}, {transform_indices = @transform_4, window_bounds = array<i64: 1, 1, 1>}]} {
    %c0_i32 = arith.constant 0 : i32
    %0 = arith.cmpi eq, %arg1, %c0_i32 : i32
    %1 = arith.extui %0 : i1 to i32
    %c0_i32_0 = arith.constant 0 : i32
    %2 = arith.cmpi ne, %1, %c0_i32_0 : i32
    scf.if %2 {
      %cst_28 = arith.constant 0.000000e+00 : f32
      %62 = vector.broadcast %cst_28 : f32 to vector<8x1xf32>
      %c0_29 = arith.constant 0 : index
      %c0_30 = arith.constant 0 : index
      %63 = vector.load %arg7[%c0_29, %c0_30] : memref<8x1xf32, #tpu.memory_space<vmem>>, vector<8x1xf32>
      tpu.vector_store %arg7[%c0_29, %c0_30], %62 {strides = array<i32>} : memref<8x1xf32, #tpu.memory_space<vmem>>, vector<8x1xf32>,
    } else {
    }
    %c0 = arith.constant 0 : index
    %3 = memref.load %arg2[%c0] : memref<1xf32, #tpu.memory_space<smem>>
    %c0_1 = arith.constant 0 : index
    %c0_2 = arith.constant 0 : index
    %4 = vector.load %arg4[%c0_1, %c0_2] : memref<8x32xf32, #tpu.memory_space<vmem>>, vector<8x32xf32>
    %c0_3 = arith.constant 0 : index
    %c0_4 = arith.constant 0 : index
    %5 = vector.load %arg3[%c0_3, %c0_4] : memref<8x32xf32, #tpu.memory_space<vmem>>, vector<8x32xf32>
    %6 = arith.mulf %5, %4 : vector<8x32xf32>
    %cst = arith.constant dense<0.000000e+00> : vector<8xf32>
    %7 = vector.multi_reduction <add>, %6, %cst [1] : vector<8x32xf32> to vector<8xf32>
    %8 = vector.shape_cast %7 : vector<8xf32> to vector<8x1xf32>
    %9 = vector.broadcast %3 : f32 to vector<8x1xf32>
    %10 = arith.mulf %8, %9 : vector<8x1xf32>
    %c0_5 = arith.constant 0 : index
    %c0_6 = arith.constant 0 : index
    %11 = vector.load %arg5[%c0_5, %c0_6] : memref<8x32xf32, #tpu.memory_space<vmem>>, vector<8x32xf32>
    %12 = arith.mulf %11, %4 : vector<8x32xf32>
    %cst_7 = arith.constant dense<0.000000e+00> : vector<8xf32>
    %13 = vector.multi_reduction <add>, %12, %cst_7 [1] : vector<8x32xf32> to vector<8xf32>
    %14 = vector.shape_cast %13 : vector<8xf32> to vector<8x1xf32>
    %15 = vector.broadcast %3 : f32 to vector<8x1xf32>
    %16 = arith.mulf %14, %15 : vector<8x1xf32>
    %c1_i32 = arith.constant 1 : i32
    %17 = arith.muli %arg0, %c1_i32 : i32
    %18 = arith.addi %17, %arg1 : i32
    %c8_i32 = arith.constant 8 : i32
    %19 = arith.muli %18, %c8_i32 : i32
    %20 = tpu.iota {dimensions = array<i32: 0>} : vector<8x1xi32>
    %21 = vector.broadcast %19 : i32 to vector<8x1xi32>
    %22 = arith.addi %21, %20 : vector<8x1xi32>
    %c8_i32_8 = arith.constant 8 : i32
    %23 = vector.broadcast %c8_i32_8 : i32 to vector<8x1xi32>
    %24 = arith.cmpi slt, %22, %23 : vector<8x1xi32>
    %cst_9 = arith.constant 0.000000e+00 : f32
    %25 = vector.broadcast %cst_9 : f32 to vector<8x1xf32>
    %26 = arith.select %24, %10, %25 : vector<8x1xi1>, vector<8x1xf32>
    %cst_10 = arith.constant 0.000000e+00 : f32
    %27 = vector.broadcast %cst_10 : f32 to vector<8x1xf32>
    %28 = arith.select %24, %16, %27 : vector<8x1xi1>, vector<8x1xf32>
    %cst_11 = arith.constant 0.000000e+00 : f32
    %29 = vector.broadcast %cst_11 : f32 to vector<8x1xf32>
    %30 = arith.subf %29, %26 : vector<8x1xf32>
    %31 = math.exp %30 : vector<8x1xf32>
    %cst_12 = arith.constant 1.000000e+00 : f32
    %32 = vector.broadcast %cst_12 : f32 to vector<8x1xf32>
    %33 = arith.addf %32, %31 : vector<8x1xf32>
    %cst_13 = arith.constant 1.000000e+00 : f32
    %34 = vector.broadcast %cst_13 : f32 to vector<8x1xf32>
    %35 = arith.divf %34, %33 : vector<8x1xf32>
    %cst_14 = arith.constant 1.000000e-15 : f32
    %36 = vector.broadcast %cst_14 : f32 to vector<8x1xf32>
    %37 = arith.addf %35, %36 : vector<8x1xf32>
    %38 = math.log %37 : vector<8x1xf32>
    %cst_15 = arith.constant 0.000000e+00 : f32
    %39 = vector.broadcast %cst_15 : f32 to vector<8x1xf32>
    %40 = arith.subf %39, %38 : vector<8x1xf32>
    %cst_16 = arith.constant 0.000000e+00 : f32
    %41 = vector.broadcast %cst_16 : f32 to vector<8x1xf32>
    %42 = arith.subf %41, %28 : vector<8x1xf32>
    %43 = math.exp %42 : vector<8x1xf32>
    %cst_17 = arith.constant 1.000000e+00 : f32
    %44 = vector.broadcast %cst_17 : f32 to vector<8x1xf32>
    %45 = arith.addf %44, %43 : vector<8x1xf32>
    %cst_18 = arith.constant 1.000000e+00 : f32
    %46 = vector.broadcast %cst_18 : f32 to vector<8x1xf32>
    %47 = arith.divf %46, %45 : vector<8x1xf32>
    %cst_19 = arith.constant 1.000000e+00 : f32
    %48 = vector.broadcast %cst_19 : f32 to vector<8x1xf32>
    %49 = arith.subf %48, %47 : vector<8x1xf32>
    %cst_20 = arith.constant 1.000000e-15 : f32
    %50 = vector.broadcast %cst_20 : f32 to vector<8x1xf32>
    %51 = arith.addf %49, %50 : vector<8x1xf32>
    %52 = math.log %51 : vector<8x1xf32>
    %53 = arith.subf %40, %52 : vector<8x1xf32>
    %cst_21 = arith.constant 0.000000e+00 : f32
    %54 = vector.broadcast %cst_21 : f32 to vector<8x1xf32>
    %55 = arith.select %24, %53, %54 : vector<8x1xi1>, vector<8x1xf32>
    %c0_22 = arith.constant 0 : index
    %c0_23 = arith.constant 0 : index
    %56 = vector.load %arg7[%c0_22, %c0_23] : memref<8x1xf32, #tpu.memory_space<vmem>>, vector<8x1xf32>
    %57 = arith.addf %56, %55 : vector<8x1xf32>
    %c0_24 = arith.constant 0 : index
    %c0_25 = arith.constant 0 : index
    %58 = vector.load %arg7[%c0_24, %c0_25] : memref<8x1xf32, #tpu.memory_space<vmem>>, vector<8x1xf32>
    tpu.vector_store %arg7[%c0_24, %c0_25], %57 {strides = array<i32>} : memref<8x1xf32, #tpu.memory_space<vmem>>, vector<8x1xf32>,
    %c0_i32_26 = arith.constant 0 : i32
    %59 = arith.cmpi eq, %arg1, %c0_i32_26 : i32
    %60 = arith.extui %59 : i1 to i32
    %c0_i32_27 = arith.constant 0 : i32
    %61 = arith.cmpi ne, %60, %c0_i32_27 : i32
    scf.if %61 {
      %c0_28 = arith.constant 0 : index
      %c0_29 = arith.constant 0 : index
      %62 = vector.load %arg7[%c0_28, %c0_29] : memref<8x1xf32, #tpu.memory_space<vmem>>, vector<8x1xf32>
      %cst_30 = arith.constant dense<0.000000e+00> : vector<1xf32>
      %63 = vector.multi_reduction <add>, %62, %cst_30 [0] : vector<8x1xf32> to vector<1xf32>
      %64 = vector.shape_cast %63 : vector<1xf32> to vector<1x1xf32>
      %65 = vector.shape_cast %64 : vector<1x1xf32> to vector<1x1x1xf32>
      %c0_31 = arith.constant 0 : index
      %c0_32 = arith.constant 0 : index
      %c0_33 = arith.constant 0 : index
      %66 = vector.load %arg6[%c0_31, %c0_32, %c0_33] : memref<1x1x1xf32, #tpu.memory_space<vmem>>, vector<1x1x1xf32>
      tpu.vector_store %arg6[%c0_31, %c0_32, %c0_33], %65 {strides = array<i32>} : memref<1x1x1xf32, #tpu.memory_space<vmem>>, vector<1x1x1xf32>,
    } else {
    }
    return
  }
  func.func @transform_0(%arg0: i32, %arg1: i32) -> i32 {
    %c0_i32 = arith.constant 0 : i32
    %c0_i32_0 = arith.constant 0 : i32
    return %c0_i32 : i32
  }
  func.func @transform_1(%arg0: i32, %arg1: i32) -> (i32, i32) {
    %c1_i32 = arith.constant 1 : i32
    %0 = arith.muli %arg0, %c1_i32 : i32
    %1 = arith.addi %0, %arg1 : i32
    %c0_i32 = arith.constant 0 : i32
    %2 = arith.minsi %1, %c0_i32 : i32
    %c0_i32_0 = arith.constant 0 : i32
    %c0_i32_1 = arith.constant 0 : i32
    return %2, %c0_i32_0 : i32, i32
  }
  func.func @transform_2(%arg0: i32, %arg1: i32) -> (i32, i32) {
    %c1_i32 = arith.constant 1 : i32
    %0 = arith.muli %arg0, %c1_i32 : i32
    %1 = arith.addi %0, %arg1 : i32
    %c0_i32 = arith.constant 0 : i32
    %2 = arith.minsi %1, %c0_i32 : i32
    %c0_i32_0 = arith.constant 0 : i32
    %c0_i32_1 = arith.constant 0 : i32
    return %2, %c0_i32_0 : i32, i32
  }
  func.func @transform_3(%arg0: i32, %arg1: i32) -> (i32, i32) {
    %c1_i32 = arith.constant 1 : i32
    %0 = arith.muli %arg0, %c1_i32 : i32
    %1 = arith.addi %0, %arg1 : i32
    %c0_i32 = arith.constant 0 : i32
    %2 = arith.minsi %1, %c0_i32 : i32
    %c0_i32_0 = arith.constant 0 : i32
    %c0_i32_1 = arith.constant 0 : i32
    return %2, %c0_i32_0 : i32, i32
  }
  func.func @transform_4(%arg0: i32, %arg1: i32) -> (i32, i32, i32) {
    %c0_i32 = arith.constant 0 : i32
    %c0_i32_0 = arith.constant 0 : i32
    %c0_i32_1 = arith.constant 0 : i32
    return %arg0, %c0_i32, %c0_i32_0 : i32, i32, i32
  }
}

</mosaic_0001>

<bundles_post_ra>
// kernel: ml_forward.1
= control target key start
LH: loop header
LB: loop body
LE: loop exit
PB: predicated region body
PF: predicated region fallthrough
CT: control target
= control target key end

     0   :  { %vm110_vm0 = vcmask 261120   ;;  %s294_s0 = inlined_call_operand.<no memory space> [shape: f32[1], index: 0, kind: input, shape index: {}]   ;;  %s295_s1 = inlined_call_operand.vmem [shape: f32[8,32], index: 1, kind: input, shape index: {}]   ;;  %s296_s2 = inlined_call_operand.vmem [shape: f32[8,32], index: 2, kind: input, shape index: {}]   ;;  %s297_s3 = inlined_call_operand.vmem [shape: f32[8,32], index: 3, kind: input, shape index: {}]   ;;  %s298_s4 = inlined_call_operand.hbm [shape: f32[1,1,1], index: 4, kind: output, shape index: {}]  }
   0x1   :  { %v107_v0 = vld [vmem:[%s296_s2] sm:$0xff] }
   0x2   :  { %v108_v1 = vld [vmem:[%s295_s1] sm:$0xff] }
   0x3   :  { %v116_v2 = vld [vmem:[%s297_s3] sm:$0xff]  ;;  %v109_v3 = vmul.f32 %v108_v1, %v107_v0 }
   0x4   :  { %v117_v4 = vmul.f32 %v116_v2, %v107_v0 }
   0x5   :  { %10 = vsyncpa [#allocation5], 0  ;;  %v111_v5 = vsel %vm110_vm0, %v109_v3, 0.0  ;;  %vm104_vm1 = vcmask 7168   ;;  %v240_v7 = vmov 0.0   ;;  %v114_v8 = vstv %s294_s0  ;;  %s241_s0 = smov [#allocation4]  }
   0x6   :  { %112 = vadd.xlane.f32.xlu0 %v111_v5  ;;  %v118_v6 = vsel %vm110_vm0, %v117_v4, 0.0  ;;  %105 = vst.msk [vmem:[#allocation2] sm:$0xff] %vm104_vm1, %v240_v7  ;;  %s176_s1 = sshll.u32 %s241_s0, 4  ;;  %vm168_vm2 = vcmask 0   ;;  %s177_s1 = int_to_ptr.vmem [resolvable:$true] %s176_s1 }
   0x7   :  { %s216_s3 = scalar_lea.vmem %s177_s1, 16  ;;  %s220_s22 = scalar_lea.vmem %s177_s1, 32 }
   0x8   :  { %p217_p0 = scmp.ne.s32.totalorder %s177_s1, %s216_s3  ;;  %p221_p1 = scmp.lt.s32.totalorder %s177_s1, %s177_s1 }
   0x9   :  { %p222_p2 = scmp.lt.s32.totalorder %s220_s22, %s216_s3 }
   0xa   :  { %119 = vadd.xlane.f32.xlu0 %v118_v6 }
   0xb   :  { %p223_p3 = por %p222_p2, %p221_p1 }
   0xd   :  { %v153_v31 = vld [vmem:[#allocation2] sm:$0xff]  ;;  %p224_p4 = pnand %p223_p3, %p217_p0 }
  0x93   :  { %v113_v9 = vpop.xlane.xlu0 %112 }
  0x94   :  { %v115_v10 = vmul.f32 %v114_v8, %v113_v9 }
  0x96   :  { %v131_v11 = vsub.f32 0.0, %v115_v10 }
  0x97   :  { %v120_v12 = vpop.xlane.xlu0 %119 }
  0x98   :  { %v132_v13 = vmul.f32 1.442695, %v131_v11  ;;  %v121_v14 = vmul.f32 %v120_v12, %v114_v8 }
  0x9a   :  { %204 = vpow2.f32 %v132_v13  ;;  %v141_v15 = vsub.f32 0.0, %v121_v14 }
  0x9c   :  { %v142_v16 = vmul.f32 1.442695, %v141_v15 }
  0x9e   :  { %206 = vpow2.f32 %v142_v16 }
  0xa4   :  { %v205_v17 = vpop.eup %204 }
  0xa5   :  { %v134_v18 = vadd.f32 1.0, %v205_v17 }
  0xa7   :  { %208 = vrcp.f32 %v134_v18 }
  0xa8   :  { %v207_v19 = vpop.eup %206 }
  0xa9   :  { %v144_v20 = vadd.f32 1.0, %v207_v19 }
  0xab   :  { %210 = vrcp.f32 %v144_v20 }
  0xb1   :  { %v209_v21 = vpop.eup %208 }
  0xb2   :  { %v137_v22 = vadd.f32 1e-15, %v209_v21 }
  0xb4   :  { %212 = vlog2.f32 %v137_v22 }
  0xb5   :  { %v211_v23 = vpop.eup %210 }
  0xb6   :  { %v147_v24 = vsub.f32 1.0, %v211_v23 }
  0xb8   :  { %v148_v25 = vadd.f32 1e-15, %v147_v24 }
  0xba   :  { %214 = vlog2.f32 %v148_v25 }
  0xbe   :  { %v213_v26 = vpop.eup %212 }
  0xbf   :  { %v139_v27 = vmul.f32 0.6931472, %v213_v26 }
  0xc1   :  { %v140_v29 = vsub.f32 0.0, %v139_v27 }
  0xc4   :  { %v215_v28 = vpop.eup %214 }
  0xc5   :  { %v150_v30 = vmul.f32 0.6931472, %v215_v28 }
  0xc7   :  { %v151_v32 = vsub.f32 %v140_v29, %v150_v30 }
  0xc9   :  { %v154_v33 = vadd.f32 %v153_v31, %v151_v32 }
  0xcb   :  { %156 = vst.msk [vmem:[#allocation2] sm:$0xff] %vm104_vm1, %v154_v33 }
  0xd2   :  { %v160_v34 = vld [vmem:[#allocation2] sm:$0xff] }
  0xd3   :  { %v161_v35 = vsel %vm104_vm1, %v160_v34, 0.0 }
  0xd4   :  { %v162_v36 = vrot.slane %v161_v35, 4 }
  0xd6   :  { %v163_v37 = vadd.f32 %v162_v36, %v161_v35 }
  0xd8   :  { %v164_v38 = vrot.slane %v163_v37, 2 }
  0xda   :  { %v165_v39 = vadd.f32 %v164_v38, %v163_v37 }
  0xdc   :  { %v166_v40 = vrot.slane %v165_v39, 1 }
  0xde   :  { %v167_v41 = vadd.f32 %v166_v40, %v165_v39 }
  0xe0   :  { %169 = vst.msk [vmem:[#allocation4] sm:$0x1] %vm168_vm2, %v167_v41 }
  0xe1   :  { %227 = shalt.err (!%p224_p4)
}
  0xe2   :  { %s228_s25 = scalar_lea.hbm %s298_s4, 16 }
  0xe3   :  { %p229_p5 = scmp.ne.s32.totalorder %s298_s4, %s228_s25  ;;  %p232_p6 = scmp.lt.u32.totalorder %s228_s25, %s298_s4 }
  0xe5   :  { %p234_p7 = pnand %p232_p6, %p229_p5 }
  0xe7   :  { %237 = shalt.err (!%p234_p7)
}
  0xe8   :  { %179 = dma.vmem_to_hbm [thread:$0]  %s177_s1, 16, %s298_s4, [#allocation5]  }
  0xe9   :  { %238 = dma.done.wait [#allocation5], 16  }
  0xea   :  { %239 = vsyncadd [#allocation5], 4294967280 }
  0xeb   :  { %183 = vsyncpa [#allocation5], 1 }

</bundles_post_ra>
